<compile_context>
chip_gen: v5e
topology: v5e:2x2
jax: 0.10.0
libtpu: 0.0.40
codegen_flags: <defaults>
</compile_context>

<pallas_src>
import jax
import jax.numpy as jnp
from jax.experimental import pallas as pl
from jax.experimental.pallas import tpu as pltpu

_LANE = 128


def _round_up(n, m):
    return ((n + m - 1) // m) * m


def _actor_kernel(max_action):
    """Kernel closure with the static max_action scale baked in."""

    def kernel(x_ref, w1_ref, b1_ref, w2_ref, b2_ref, w3_ref, b3_ref, out_ref):
        # fc1 + relu: bf16 inputs into MXU, f32 accumulate, f32 bias/ReLU.
        x = x_ref[...].astype(jnp.bfloat16)
        h1 = jnp.dot(x, w1_ref[...], preferred_element_type=jnp.float32)
        h1 = jnp.maximum(h1 + b1_ref[...], 0.0)

        # fc2 + relu
        h2 = jnp.dot(h1.astype(jnp.bfloat16), w2_ref[...],
                     preferred_element_type=jnp.float32)
        h2 = jnp.maximum(h2 + b2_ref[...], 0.0)

        # action_out + tanh (EUP) * max_action, lane-dense 128-wide bf16 store.
        a = jnp.dot(h2.astype(jnp.bfloat16), w3_ref[...],
                    preferred_element_type=jnp.float32)
        out_ref[...] = (max_action * jnp.tanh(a + b3_ref[...])).astype(out_ref.dtype)

    return kernel


def actor_forward(x, params, max_action, *, b_tile=1024):
    """Run the fused Actor MLP in a single batch-tiled Pallas kernel.

    x:      (B, obs+goal) float32
    params: prepared dict (see prepare_actor_params): bf16 weights
            w1 (D,256), w2 (256,256), w3 (256,A_pad); f32 biases
            b1/b2 (1,256), b3 (1,A_pad); plus "action_dim".
    """
    B, D = x.shape
    H = params["w1"].shape[1]
    A_pad = params["w3"].shape[1]
    A = params["action_dim"]

    # Batch tile: multiple of 8 sublanes; no wrapper padding (cdiv grid).
    bt = min(b_tile, _round_up(B, 8))
    if B >= 16:
        # Guarantee >= 2 grid steps so "parallel" shards across v7x's 2 TCs.
        bt = min(bt, _round_up(pl.cdiv(B, 2), 8))
    grid = (pl.cdiv(B, bt),)
    rows = grid[0] * bt  # rows actually pushed through the pipeline

    # VMEM budget derived from the real buffers (review item for v5e):
    #   weights/biases (single-buffered) + 2x (x tile + bf16 out tile)
    #   + generous allowance for in-body f32/bf16 temporaries.
    weight_bytes = (D * H + H * H + H * A_pad) * 2 + (2 * H + A_pad) * 4
    io_bytes = 2 * (bt * D * 4 + bt * A_pad * 2)
    temp_bytes = 8 * bt * H * 4
    vmem_limit = weight_bytes + io_bytes + temp_bytes + (4 << 20)
    vmem_limit = min(max(vmem_limit, 16 << 20), 48 << 20)

    flops = 2 * rows * (D * H + H * H + H * A_pad)
    bytes_accessed = (
        B * D * 4                          # x
        + (D * H + H * H + H * A_pad) * 2  # bf16 weights (DMA'd once)
        + (2 * H + A_pad) * 4              # f32 biases
        + B * A_pad * 2                    # bf16 output
    )

    resident = dict(pipeline_mode=pl.Buffered(1))  # grid-invariant operands

    out = pl.pallas_call(
        _actor_kernel(float(max_action)),
        out_shape=jax.ShapeDtypeStruct((B, A_pad), jnp.bfloat16),
        grid=grid,
        in_specs=[
            pl.BlockSpec((bt, D), lambda i: (i, 0)),             # x tile, pipelined
            pl.BlockSpec((D, H), lambda i: (0, 0), **resident),  # weights resident
            pl.BlockSpec((1, H), lambda i: (0, 0), **resident),
            pl.BlockSpec((H, H), lambda i: (0, 0), **resident),
            pl.BlockSpec((1, H), lambda i: (0, 0), **resident),
            pl.BlockSpec((H, A_pad), lambda i: (0, 0), **resident),
            pl.BlockSpec((1, A_pad), lambda i: (0, 0), **resident),
        ],
        out_specs=pl.BlockSpec((bt, A_pad), lambda i: (i, 0)),
        compiler_params=pltpu.CompilerParams(
            dimension_semantics=("parallel",),       # megacore on v7x
            vmem_limit_bytes=int(vmem_limit),
        ),
        cost_estimate=pl.CostEstimate(
            flops=flops,
            transcendentals=rows * A_pad,
            bytes_accessed=bytes_accessed,
        ),
    )(x, params["w1"], params["b1"], params["w2"], params["b2"],
      params["w3"], params["b3"])

    # TODO(synk): in a full DDPG pipeline, fuse this slice/cast into the
    # consumer instead of materializing a separate XLA pass.
    return out[:, :A].astype(jnp.float32)


def init_actor_params(key, obs, goal, action, hidden=256):
    """Deterministic f32 init mimicking PyTorch nn.Linear default U[-1/sqrt(fan_in), +]."""
    d_in = obs + goal
    ks = jax.random.split(key, 6)

    def uniform(k, shape, fan_in):
        bound = 1.0 / float(fan_in) ** 0.5
        return jax.random.uniform(k, shape, jnp.float32, -bound, bound)

    return {
        "w1": uniform(ks[0], (d_in, hidden), d_in),
        "b1": uniform(ks[1], (1, hidden), d_in),
        "w2": uniform(ks[2], (hidden, hidden), hidden),
        "b2": uniform(ks[3], (1, hidden), hidden),
        "w3": uniform(ks[4], (hidden, action), hidden),
        "b3": uniform(ks[5], (1, action), hidden),
    }


def prepare_actor_params(params_f32):
    """Cast weights to bf16 and pad the output layer to 128 lanes (lane-dense store)."""
    H, A = params_f32["w3"].shape
    A_pad = _round_up(A, _LANE)
    w3 = jnp.zeros((H, A_pad), jnp.bfloat16).at[:, :A].set(
        params_f32["w3"].astype(jnp.bfloat16))
    b3 = jnp.zeros((1, A_pad), jnp.float32).at[:, :A].set(params_f32["b3"])
    return {
        "w1": params_f32["w1"].astype(jnp.bfloat16),
        "b1": params_f32["b1"].astype(jnp.float32),
        "w2": params_f32["w2"].astype(jnp.bfloat16),
        "b2": params_f32["b2"].astype(jnp.float32),
        "w3": w3,
        "b3": b3,
        "action_dim": A,
    }


def actor_reference(x, prepared, max_action):
    """Pure-JAX reference mirroring the kernel's bf16-in / f32-acc / bf16-out math."""
    A = prepared["action_dim"]
    w1 = prepared["w1"].astype(jnp.float32)
    w2 = prepared["w2"].astype(jnp.float32)
    w3 = prepared["w3"].astype(jnp.float32)

    def bf16(v):
        return v.astype(jnp.bfloat16).astype(jnp.float32)

    h1 = jnp.maximum(bf16(x) @ w1 + prepared["b1"], 0.0)
    h2 = jnp.maximum(bf16(h1) @ w2 + prepared["b2"], 0.0)
    a = max_action * jnp.tanh(bf16(h2) @ w3 + prepared["b3"])
    return bf16(a)[:, :A]


if __name__ == "__main__":
    # Small env: obs=12, goal=4, action=4, max_action=1.0
    env_params = {"obs": 12, "goal": 4, "action": 4, "action_max": 1.0}

    key = jax.random.PRNGKey(0)
    k_param, k_x1, k_x2, k_x3 = jax.random.split(key, 4)

    params_f32 = init_actor_params(
        k_param, env_params["obs"], env_params["goal"], env_params["action"]
    )
    params = prepare_actor_params(params_f32)
    d_in = env_params["obs"] + env_params["goal"]
    max_a = env_params["action_max"]

    def check(x, tag):
        out = jax.block_until_ready(actor_forward(x, params, max_a))
        ref = jax.block_until_ready(actor_reference(x, params, max_a))
        assert out.shape == (x.shape[0], env_params["action"]), tag
        assert jnp.allclose(out, ref, atol=1e-2, rtol=1e-2), f"mismatch vs reference ({tag})"

    # Small batch: single grid step.
    check(jax.random.normal(k_x1, (8, d_in), jnp.float32), "B=8")

    # Larger batch: exercises >=2-step parallel grid + ragged final block.
    check(jax.random.normal(k_x2, (200, d_in), jnp.float32), "B=200")

    # Tiny ragged batch (< one 8-row sublane block): OOB rows dropped.
    check(jax.random.normal(k_x3, (5, d_in), jnp.float32), "B=5")

    print("KERNEL_OK")
</pallas_src>

<mosaic_0001>
module attributes {stable_mosaic.version = 11 : i64} {
  func.func @kernel(%arg0: i32, %arg1: memref<8x16xf32, #tpu.memory_space<vmem>>, %arg2: memref<16x256xbf16, #tpu.memory_space<vmem>>, %arg3: memref<1x256xf32, #tpu.memory_space<vmem>>, %arg4: memref<256x256xbf16, #tpu.memory_space<vmem>>, %arg5: memref<1x256xf32, #tpu.memory_space<vmem>>, %arg6: memref<256x128xbf16, #tpu.memory_space<vmem>>, %arg7: memref<1x128xf32, #tpu.memory_space<vmem>>, %arg8: memref<8x128xbf16, #tpu.memory_space<vmem>>) attributes {dimension_semantics = [#tpu.dimension_semantics<parallel>], iteration_bounds = array<i64: 1>, scalar_prefetch = 0 : i64, scratch_operands = 0 : i64, tpu.core_type = #tpu.core_type<tc>, window_params = [{transform_indices = @transform_0, window_bounds = array<i64: 8, 16>}, {pipeline_mode = #tpu.pipeline_mode<synchronous>, transform_indices = @transform_1, window_bounds = array<i64: 16, 256>}, {pipeline_mode = #tpu.pipeline_mode<synchronous>, transform_indices = @transform_2, window_bounds = array<i64: 1, 256>}, {pipeline_mode = #tpu.pipeline_mode<synchronous>, transform_indices = @transform_3, window_bounds = array<i64: 256, 256>}, {pipeline_mode = #tpu.pipeline_mode<synchronous>, transform_indices = @transform_4, window_bounds = array<i64: 1, 256>}, {pipeline_mode = #tpu.pipeline_mode<synchronous>, transform_indices = @transform_5, window_bounds = array<i64: 256, 128>}, {pipeline_mode = #tpu.pipeline_mode<synchronous>, transform_indices = @transform_6, window_bounds = array<i64: 1, 128>}, {transform_indices = @transform_7, window_bounds = array<i64: 8, 128>}]} {
    %c0 = arith.constant 0 : index
    %c0_0 = arith.constant 0 : index
    %0 = vector.load %arg1[%c0, %c0_0] : memref<8x16xf32, #tpu.memory_space<vmem>>, vector<8x16xf32>
    %1 = arith.truncf %0 : vector<8x16xf32> to vector<8x16xbf16>
    %c0_1 = arith.constant 0 : index
    %c0_2 = arith.constant 0 : index
    %2 = vector.load %arg2[%c0_1, %c0_2] : memref<16x256xbf16, #tpu.memory_space<vmem>>, vector<16x256xbf16>
    %cst = arith.constant dense<0.000000e+00> : vector<8x256xf32>
    %3 = tpu.matmul %1, %2, %cst {dimension_numbers = #tpu.dot_dimension_numbers<[1], [0], [0], [1], [0, 0, 1, 1], [], []>} : vector<8x16xbf16>, vector<16x256xbf16>, vector<8x256xf32> -> vector<8x256xf32>
    %c0_3 = arith.constant 0 : index
    %c0_4 = arith.constant 0 : index
    %4 = vector.load %arg3[%c0_3, %c0_4] : memref<1x256xf32, #tpu.memory_space<vmem>>, vector<1x256xf32>
    %5 = vector.broadcast %4 : vector<1x256xf32> to vector<8x256xf32>
    %6 = arith.addf %3, %5 : vector<8x256xf32>
    %cst_5 = arith.constant 0.000000e+00 : f32
    %7 = vector.broadcast %cst_5 : f32 to vector<8x256xf32>
    %8 = arith.maximumf %6, %7 : vector<8x256xf32>
    %9 = arith.truncf %8 : vector<8x256xf32> to vector<8x256xbf16>
    %c0_6 = arith.constant 0 : index
    %c0_7 = arith.constant 0 : index
    %10 = vector.load %arg4[%c0_6, %c0_7] : memref<256x256xbf16, #tpu.memory_space<vmem>>, vector<256x256xbf16>
    %cst_8 = arith.constant dense<0.000000e+00> : vector<8x256xf32>
    %11 = tpu.matmul %9, %10, %cst_8 {dimension_numbers = #tpu.dot_dimension_numbers<[1], [0], [0], [1], [0, 0, 1, 1], [], []>} : vector<8x256xbf16>, vector<256x256xbf16>, vector<8x256xf32> -> vector<8x256xf32>
    %c0_9 = arith.constant 0 : index
    %c0_10 = arith.constant 0 : index
    %12 = vector.load %arg5[%c0_9, %c0_10] : memref<1x256xf32, #tpu.memory_space<vmem>>, vector<1x256xf32>
    %13 = vector.broadcast %12 : vector<1x256xf32> to vector<8x256xf32>
    %14 = arith.addf %11, %13 : vector<8x256xf32>
    %cst_11 = arith.constant 0.000000e+00 : f32
    %15 = vector.broadcast %cst_11 : f32 to vector<8x256xf32>
    %16 = arith.maximumf %14, %15 : vector<8x256xf32>
    %17 = arith.truncf %16 : vector<8x256xf32> to vector<8x256xbf16>
    %c0_12 = arith.constant 0 : index
    %c0_13 = arith.constant 0 : index
    %18 = vector.load %arg6[%c0_12, %c0_13] : memref<256x128xbf16, #tpu.memory_space<vmem>>, vector<256x128xbf16>
    %cst_14 = arith.constant dense<0.000000e+00> : vector<8x128xf32>
    %19 = tpu.matmul %17, %18, %cst_14 {dimension_numbers = #tpu.dot_dimension_numbers<[1], [0], [0], [1], [0, 0, 1, 1], [], []>} : vector<8x256xbf16>, vector<256x128xbf16>, vector<8x128xf32> -> vector<8x128xf32>
    %c0_15 = arith.constant 0 : index
    %c0_16 = arith.constant 0 : index
    %20 = vector.load %arg7[%c0_15, %c0_16] : memref<1x128xf32, #tpu.memory_space<vmem>>, vector<1x128xf32>
    %21 = vector.broadcast %20 : vector<1x128xf32> to vector<8x128xf32>
    %22 = arith.addf %19, %21 : vector<8x128xf32>
    %23 = math.tanh %22 : vector<8x128xf32>
    %cst_17 = arith.constant 1.000000e+00 : f32
    %24 = vector.broadcast %cst_17 : f32 to vector<8x128xf32>
    %25 = arith.mulf %24, %23 : vector<8x128xf32>
    %26 = arith.truncf %25 : vector<8x128xf32> to vector<8x128xbf16>
    %c0_18 = arith.constant 0 : index
    %c0_19 = arith.constant 0 : index
    %27 = vector.load %arg8[%c0_18, %c0_19] : memref<8x128xbf16, #tpu.memory_space<vmem>>, vector<8x128xbf16>
    tpu.vector_store %arg8[%c0_18, %c0_19], %26 {strides = array<i32>} : memref<8x128xbf16, #tpu.memory_space<vmem>>, vector<8x128xbf16>,
    return
  }
  func.func @transform_0(%arg0: i32) -> (i32, i32) {
    %c0_i32 = arith.constant 0 : i32
    %c0_i32_0 = arith.constant 0 : i32
    return %arg0, %c0_i32 : i32, i32
  }
  func.func @transform_1(%arg0: i32) -> (i32, i32) {
    %c0_i32 = arith.constant 0 : i32
    %c0_i32_0 = arith.constant 0 : i32
    %c0_i32_1 = arith.constant 0 : i32
    return %c0_i32, %c0_i32_0 : i32, i32
  }
  func.func @transform_2(%arg0: i32) -> (i32, i32) {
    %c0_i32 = arith.constant 0 : i32
    %c0_i32_0 = arith.constant 0 : i32
    %c0_i32_1 = arith.constant 0 : i32
    return %c0_i32, %c0_i32_0 : i32, i32
  }
  func.func @transform_3(%arg0: i32) -> (i32, i32) {
    %c0_i32 = arith.constant 0 : i32
    %c0_i32_0 = arith.constant 0 : i32
    %c0_i32_1 = arith.constant 0 : i32
    return %c0_i32, %c0_i32_0 : i32, i32
  }
  func.func @transform_4(%arg0: i32) -> (i32, i32) {
    %c0_i32 = arith.constant 0 : i32
    %c0_i32_0 = arith.constant 0 : i32
    %c0_i32_1 = arith.constant 0 : i32
    return %c0_i32, %c0_i32_0 : i32, i32
  }
  func.func @transform_5(%arg0: i32) -> (i32, i32) {
    %c0_i32 = arith.constant 0 : i32
    %c0_i32_0 = arith.constant 0 : i32
    %c0_i32_1 = arith.constant 0 : i32
    return %c0_i32, %c0_i32_0 : i32, i32
  }
  func.func @transform_6(%arg0: i32) -> (i32, i32) {
    %c0_i32 = arith.constant 0 : i32
    %c0_i32_0 = arith.constant 0 : i32
    %c0_i32_1 = arith.constant 0 : i32
    return %c0_i32, %c0_i32_0 : i32, i32
  }
  func.func @transform_7(%arg0: i32) -> (i32, i32) {
    %c0_i32 = arith.constant 0 : i32
    %c0_i32_0 = arith.constant 0 : i32
    return %arg0, %c0_i32 : i32, i32
  }
}

</mosaic_0001>

<bundles_post_ra>
// kernel: tpu_custom_call.1
= control target key start
LH: loop header
LB: loop body
LE: loop exit
PB: predicated region body
PF: predicated region fallthrough
CT: control target
= control target key end

     0   :  { %12 = vsyncpa [#allocation3], 0  ;;  %s1083_s0 = inlined_call_operand.hbm [shape: f32[8,16], index: 0, kind: input, shape index: {}]   ;;  %s1084_s1 = inlined_call_operand.hbm [shape: bf16[16,256], index: 1, kind: input, shape index: {}]   ;;  %s1085_s2 = inlined_call_operand.hbm [shape: f32[1,256], index: 2, kind: input, shape index: {}]   ;;  %s1086_s3 = inlined_call_operand.hbm [shape: bf16[256,256], index: 3, kind: input, shape index: {}]   ;;  %s1087_s4 = inlined_call_operand.vmem [shape: f32[1,256], index: 4, kind: input, shape index: {}]   ;;  %s1088_s5 = inlined_call_operand.hbm [shape: bf16[256,128], index: 5, kind: input, shape index: {}]   ;;  %s1089_s6 = inlined_call_operand.vmem [shape: f32[1,128], index: 6, kind: input, shape index: {}]   ;;  %s1090_s7 = inlined_call_operand.hbm [shape: bf16[8,128], index: 7, kind: output, shape index: {}]  }
   0x1   :  { %13 = vsyncpa [#allocation6], 0 }
   0x2   :  { %14 = vsyncpa [#allocation9], 0  ;;  %s31_s26 = sshll.u32 %s1084_s1, 4  ;;  %s32_s26 = int_to_ptr.hbm [resolvable:$true] %s31_s26 }
   0x3   :  { %15 = vsyncpa [#allocation4], 0  ;;  %s1007_s27 = smov [#allocation5]   ;;  %s55_s8 = sshll.u32 %s1086_s3, 4  ;;  %s56_s8 = int_to_ptr.hbm [resolvable:$true] %s55_s8 }
   0x4   :  { %s33_s28 = sshll.u32 %s1007_s27, 4  ;;  %s1008_s9 = smov 128   ;;  %s34_s28 = int_to_ptr.vmem [resolvable:$true] %s33_s28 }
   0x5   :  { %s1009_s10 = smov 8   ;;  %s1010_s11 = smov [#allocation8]  }
   0x6   :  { %39 = dma.hbm_to_vmem [thread:$0]  %s32_s26, 256, %s34_s28, [#allocation6], %s1008_s9, %s1008_s9, %s1009_s10  }
   0x7   :  { %s57_s12 = sshll.u32 %s1010_s11, 4  ;;  %s21_s15 = sshll.u32 %s1083_s0, 4  ;;  %s58_s12 = int_to_ptr.vmem [resolvable:$true] %s57_s12  ;;  %s22_s15 = int_to_ptr.hbm [resolvable:$true] %s21_s15 }
   0x8   :  { %63 = dma.hbm_to_vmem [thread:$0]  %s56_s8, 4096, %s58_s12, [#allocation9], %s1008_s9, %s1008_s9, %s1009_s10  }
   0x9   :  { %s45_s17 = sshll.u32 %s1085_s2, 4  ;;  %s1011_s18 = smov [#allocation2]   ;;  %s46_s17 = int_to_ptr.hbm [resolvable:$true] %s45_s17 }
   0xa   :  { %s23_s19 = sshll.u32 %s1011_s18, 4  ;;  %s1012_s3 = smov [#allocation7]   ;;  %s24_s19 = int_to_ptr.vmem [resolvable:$true] %s23_s19 }
   0xb   :  { %26 = dma.hbm_to_vmem [thread:$0]  %s22_s15, 128, %s24_s19, [#allocation3]  }
   0xc   :  { %s47_s20 = sshll.u32 %s1012_s3, 4  ;;  %s70_s23 = sshll.u32 %s1088_s5, 4  ;;  %s48_s20 = int_to_ptr.vmem [resolvable:$true] %s47_s20  ;;  %s71_s23 = int_to_ptr.hbm [resolvable:$true] %s70_s23 }
   0xd   :  { %50 = dma.hbm_to_vmem [thread:$0]  %s46_s17, 32, %s48_s20, [#allocation6]  }
   0xe   :  { %s1013_s0 = smov [#allocation10]   ;;  %s1014_s25 = smov 64  }
   0xf   :  { %s72_s24 = sshll.u32 %s1013_s0, 4  ;;  %s1015_s26 = smov 4   ;;  %s73_s24 = int_to_ptr.vmem [resolvable:$true] %s72_s24 }
  0x10   :  { %78 = dma.hbm_to_vmem [thread:$0]  %s71_s23, 2048, %s73_s24, [#allocation9], %s1014_s25, %s1014_s25, %s1015_s26  }
  0x11   :  { %999 = dma.done.wait [#allocation3], 128  }
  0x12   :  { %1000 = vsyncadd [#allocation3], 4294967168 }
  0x13   :  { %1001 = dma.done.wait [#allocation6], 288  }
  0x14   :  { %1002 = vsyncadd [#allocation6], 4294967008 }
  0x15   :  { %1003 = dma.done.wait [#allocation9], 6144  }
  0x16   :  { %1004 = vsyncadd [#allocation9], 4294961152  ;;  %v592_v0 = vld [vmem:[#allocation5] sm:$0xf]  ;;  %v793_v1 = vld [vmem:[#allocation5 + $0x4] sm:$0xf0] }
  0x17   :  { %v792_v2 = vld [vmem:[#allocation5 + $0x4] sm:$0xf]  ;;  %v593_v3 = vor.u32 %v793_v1, %v592_v0  ;;  %v594_v4 = vld [vmem:[#allocation5 + $0x8] sm:$0xf0]  ;;  %v102_v5 = vld [vmem:[#allocation2] sm:$0xff]  ;;  %vm122_vm0 = vcmask 130048  }
  0x18   :  { %v658_v6 = vld [vmem:[#allocation8 + $0x70] sm:$0xf]  ;;  %v597_v7 = vor.u32 %v792_v2, %v594_v4  ;;  %v103_v8 = vpack.c.bf16 %v102_v5, %v102_v5  ;;  %v809_v9 = vld [vmem:[#allocation8 + $0x74] sm:$0xf0]  ;;  %v808_v14 = vld [vmem:[#allocation8 + $0x74] sm:$0xf] }
  0x19   :  { %v722_v10 = vld [vmem:[#allocation8 + $0xf0] sm:$0xf]  ;;  %v825_v11 = vld [vmem:[#allocation8 + $0xf4] sm:$0xf0]  ;;  %133 = vmatpush.bf16.msra.mxu0 %v593_v3  ;;  %v659_v12 = vor.u32 %v809_v9, %v658_v6  ;;  %v660_v15 = vld [vmem:[#allocation8 + $0x78] sm:$0xf0] }
  0x1a   :  { %v723_v13 = vor.u32 %v825_v11, %v722_v10  ;;  %v824_v16 = vld [vmem:[#allocation8 + $0xf4] sm:$0xf]  ;;  %146 = vmatpush.bf16.msra.mxu1 %v597_v7  ;;  %v663_v17 = vor.u32 %v808_v14, %v660_v15  ;;  %v724_v18 = vld [vmem:[#allocation8 + $0xf8] sm:$0xf0]  ;;  %v650_v19 = vld [vmem:[#allocation8 + $0x60] sm:$0xf] }
  0x1b   :  { %v807_v20 = vld [vmem:[#allocation8 + $0x64] sm:$0xf0]  ;;  %354 = vmatpush.bf16.msra.mxu2 %v659_v12  ;;  %v727_v21 = vor.u32 %v824_v16, %v724_v18  ;;  %v714_v23 = vld [vmem:[#allocation8 + $0xe0] sm:$0xf]  ;;  %v806_v25 = vld [vmem:[#allocation8 + $0x64] sm:$0xf] }
  0x1c   :  { %367 = vmatpush.bf16.msra.mxu3 %v723_v13  ;;  %v651_v22 = vor.u32 %v807_v20, %v650_v19  ;;  %v823_v24 = vld [vmem:[#allocation8 + $0xe4] sm:$0xf0]  ;;  %598 = vmatmul.msk.bf16.vlgmr.msra.gmra.mxu0 %vm122_vm0, %v103_v8  ;;  %v652_v27 = vld [vmem:[#allocation8 + $0x68] sm:$0xf0]  ;;  %v822_v28 = vld [vmem:[#allocation8 + $0xe4] sm:$0xf] }
  0x1d   :  { %v715_v26 = vor.u32 %v823_v24, %v714_v23  ;;  %v716_v29 = vld [vmem:[#allocation8 + $0xe8] sm:$0xf0]  ;;  %599 = vmatmul.msk.bf16.vlgmr.msra.gmra.mxu1 %vm122_vm0, %v103_v8  ;;  %380 = vmatpush.bf16.msrb.mxu0 %v663_v17  ;;  %v655_v30 = vor.u32 %v806_v25, %v652_v27  ;;  %v642_v31 = vld [vmem:[#allocation8 + $0x50] sm:$0xf]  ;;  %v805_v32 = vld [vmem:[#allocation8 + $0x54] sm:$0xf0] }
  0x1e   :  { %v706_v33 = vld [vmem:[#allocation8 + $0xd0] sm:$0xf]  ;;  %393 = vmatpush.bf16.msrb.mxu1 %v727_v21  ;;  %v719_v34 = vor.u32 %v822_v28, %v716_v29  ;;  %v821_v35 = vld [vmem:[#allocation8 + $0xd4] sm:$0xf0]  ;;  %v804_v36 = vld [vmem:[#allocation8 + $0x54] sm:$0xf]  ;;  %v643_v38 = vor.u32 %v805_v32, %v642_v31 }
  0x1f   :  { %v644_v37 = vld [vmem:[#allocation8 + $0x58] sm:$0xf0]  ;;  %355 = vmatpush.bf16.msra.mxu2 %v651_v22  ;;  %v707_v39 = vor.u32 %v821_v35, %v706_v33  ;;  %v820_v40 = vld [vmem:[#allocation8 + $0xd4] sm:$0xf]  ;;  %v634_v42 = vld [vmem:[#allocation8 + $0x40] sm:$0xf] }
  0x20   :  { %368 = vmatpush.bf16.msra.mxu3 %v715_v26  ;;  %v708_v41 = vld [vmem:[#allocation8 + $0xd8] sm:$0xf0]  ;;  %v803_v43 = vld [vmem:[#allocation8 + $0x44] sm:$0xf0]  ;;  %v698_v44 = vld [vmem:[#allocation8 + $0xc0] sm:$0xf]  ;;  %v647_v46 = vor.u32 %v804_v36, %v644_v37 }
  0x21   :  { %v819_v45 = vld [vmem:[#allocation8 + $0xc4] sm:$0xf0]  ;;  %381 = vmatpush.bf16.msrb.mxu0 %v655_v30  ;;  %v711_v47 = vor.u32 %v820_v40, %v708_v41  ;;  %v802_v48 = vld [vmem:[#allocation8 + $0x44] sm:$0xf]  ;;  %v636_v49 = vld [vmem:[#allocation8 + $0x48] sm:$0xf0]  ;;  %v635_v50 = vor.u32 %v803_v43, %v634_v42 }
  0x22   :  { %394 = vmatpush.bf16.msrb.mxu1 %v719_v34  ;;  %v699_v51 = vor.u32 %v819_v45, %v698_v44  ;;  %v818_v52 = vld [vmem:[#allocation8 + $0xc4] sm:$0xf]  ;;  %v700_v53 = vld [vmem:[#allocation8 + $0xc8] sm:$0xf0]  ;;  %v626_v54 = vld [vmem:[#allocation8 + $0x30] sm:$0xf]  ;;  %v639_v58 = vor.u32 %v802_v48, %v636_v49 }
  0x23   :  { %356 = vmatpush.bf16.msra.mxu2 %v643_v38  ;;  %v801_v55 = vld [vmem:[#allocation8 + $0x34] sm:$0xf0]  ;;  %v690_v56 = vld [vmem:[#allocation8 + $0xb0] sm:$0xf]  ;;  %v703_v59 = vor.u32 %v818_v52, %v700_v53  ;;  %v800_v60 = vld [vmem:[#allocation8 + $0x34] sm:$0xf] }
  0x24   :  { %369 = vmatpush.bf16.msra.mxu3 %v707_v39  ;;  %v817_v57 = vld [vmem:[#allocation8 + $0xb4] sm:$0xf0]  ;;  %v628_v61 = vld [vmem:[#allocation8 + $0x38] sm:$0xf0]  ;;  %v816_v62 = vld [vmem:[#allocation8 + $0xb4] sm:$0xf]  ;;  %v627_v63 = vor.u32 %v801_v55, %v626_v54 }
  0x25   :  { %382 = vmatpush.bf16.msrb.mxu0 %v647_v46  ;;  %v691_v0 = vor.u32 %v817_v57, %v690_v56  ;;  %v692_v1 = vld [vmem:[#allocation8 + $0xb8] sm:$0xf0]  ;;  %v618_v2 = vld [vmem:[#allocation8 + $0x20] sm:$0xf]  ;;  %v799_v3 = vld [vmem:[#allocation8 + $0x24] sm:$0xf0]  ;;  %v631_v6 = vor.u32 %v800_v60, %v628_v61 }
  0x26   :  { %395 = vmatpush.bf16.msrb.mxu1 %v711_v47  ;;  %v682_v4 = vld [vmem:[#allocation8 + $0xa0] sm:$0xf]  ;;  %v815_v5 = vld [vmem:[#allocation8 + $0xa4] sm:$0xf0]  ;;  %v695_v7 = vor.u32 %v816_v62, %v692_v1  ;;  %v798_v8 = vld [vmem:[#allocation8 + $0x24] sm:$0xf]  ;;  %v619_v10 = vor.u32 %v799_v3, %v618_v2 }
  0x27   :  { %357 = vmatpush.bf16.msra.mxu2 %v635_v50  ;;  %v620_v9 = vld [vmem:[#allocation8 + $0x28] sm:$0xf0]  ;;  %v683_v11 = vor.u32 %v815_v5, %v682_v4  ;;  %v814_v12 = vld [vmem:[#allocation8 + $0xa4] sm:$0xf]  ;;  %v610_v16 = vld [vmem:[#allocation8 + $0x10] sm:$0xf] }
  0x28   :  { %370 = vmatpush.bf16.msra.mxu3 %v699_v51  ;;  %v684_v13 = vld [vmem:[#allocation8 + $0xa8] sm:$0xf0]  ;;  %v623_v14 = vor.u32 %v798_v8, %v620_v9  ;;  %v797_v17 = vld [vmem:[#allocation8 + $0x14] sm:$0xf0]  ;;  %v674_v18 = vld [vmem:[#allocation8 + $0x90] sm:$0xf] }
  0x29   :  { %383 = vmatpush.bf16.msrb.mxu0 %v639_v58  ;;  %v687_v15 = vor.u32 %v814_v12, %v684_v13  ;;  %v611_v19 = vor.u32 %v797_v17, %v610_v16  ;;  %v813_v20 = vld [vmem:[#allocation8 + $0x94] sm:$0xf0]  ;;  %v796_v21 = vld [vmem:[#allocation8 + $0x14] sm:$0xf]  ;;  %v612_v22 = vld [vmem:[#allocation8 + $0x18] sm:$0xf0] }
  0x2a   :  { %396 = vmatpush.bf16.msrb.mxu1 %v703_v59  ;;  %v675_v23 = vor.u32 %v813_v20, %v674_v18  ;;  %v615_v24 = vor.u32 %v796_v21, %v612_v22  ;;  %v812_v25 = vld [vmem:[#allocation8 + $0x94] sm:$0xf]  ;;  %v676_v26 = vld [vmem:[#allocation8 + $0x98] sm:$0xf0]  ;;  %v602_v28 = vld [vmem:[#allocation8] sm:$0xf] }
  0x2b   :  { %358 = vmatpush.bf16.msra.mxu2 %v627_v63  ;;  %v679_v27 = vor.u32 %v812_v25, %v676_v26  ;;  %v795_v29 = vld [vmem:[#allocation8 + $0x4] sm:$0xf0]  ;;  %v666_v30 = vld [vmem:[#allocation8 + $0x80] sm:$0xf]  ;;  %v794_v33 = vld [vmem:[#allocation8 + $0x4] sm:$0xf] }
  0x2c   :  { %371 = vmatpush.bf16.msra.mxu3 %v691_v0  ;;  %v603_v31 = vor.u32 %v795_v29, %v602_v28  ;;  %v811_v32 = vld [vmem:[#allocation8 + $0x84] sm:$0xf0]  ;;  %v604_v34 = vld [vmem:[#allocation8 + $0x8] sm:$0xf0]  ;;  %v810_v37 = vld [vmem:[#allocation8 + $0x84] sm:$0xf] }
  0x2d   :  { %384 = vmatpush.bf16.msrb.mxu0 %v631_v6  ;;  %v667_v35 = vor.u32 %v811_v32, %v666_v30  ;;  %v607_v36 = vor.u32 %v794_v33, %v604_v34  ;;  %v668_v38 = vld [vmem:[#allocation8 + $0x88] sm:$0xf0]  ;;  %v841_v40 = vld [vmem:[#allocation10 + $0x78] sm:$0xff]  ;;  %v840_v42 = vld [vmem:[#allocation10 + $0x70] sm:$0xff]  ;;  %s1016_s28 = smov [#allocation11]   ;;  %s578_s9 = sshll.u32 %s1090_s7, 4  ;;  %s579_s9 = int_to_ptr.hbm [resolvable:$true] %s578_s9 }
  0x2e   :  { %397 = vmatpush.bf16.msrb.mxu1 %v695_v7  ;;  %v671_v39 = vor.u32 %v810_v37, %v668_v38  ;;  %v833_v41 = vld [vmem:[#allocation10 + $0x38] sm:$0xff]  ;;  %v832_v43 = vld [vmem:[#allocation10 + $0x30] sm:$0xff]  ;;  %v839_v44 = vld [vmem:[#allocation10 + $0x68] sm:$0xff]  ;;  %s576_s29 = sshll.u32 %s1016_s28, 4  ;;  %s577_s29 = int_to_ptr.vmem [resolvable:$true] %s576_s29 }
  0x2f   :  { %359 = vmatpush.bf16.msra.mxu2 %v619_v10  ;;  %v831_v45 = vld [vmem:[#allocation10 + $0x28] sm:$0xff]  ;;  %v838_v46 = vld [vmem:[#allocation10 + $0x60] sm:$0xff]  ;;  %v837_v48 = vld [vmem:[#allocation10 + $0x58] sm:$0xff] }
  0x30   :  { %372 = vmatpush.bf16.msra.mxu3 %v683_v11  ;;  %v830_v47 = vld [vmem:[#allocation10 + $0x20] sm:$0xff]  ;;  %v106_v49 = vld [vmem:[#allocation7] sm:$0x3]  ;;  %v836_v50 = vld [vmem:[#allocation10 + $0x50] sm:$0xff] }
  0x31   :  { %385 = vmatpush.bf16.msrb.mxu0 %v623_v14  ;;  %v108_v51 = vperm.slane %v106_v49, 0  ;;  %v109_v52 = vperm.slane %v106_v49, 1  ;;  %v829_v63 = vld [vmem:[#allocation10 + $0x18] sm:$0xff]  ;;  %v835_v0 = vld [vmem:[#allocation10 + $0x48] sm:$0xff]  ;;  %v828_v1 = vld [vmem:[#allocation10 + $0x10] sm:$0xff] }
  0x32   :  { %398 = vmatpush.bf16.msrb.mxu1 %v687_v15  ;;  %v834_v2 = vld [vmem:[#allocation10 + $0x40] sm:$0xff]  ;;  %v827_v3 = vld [vmem:[#allocation10 + $0x8] sm:$0xff] }
  0x33   :  { %360 = vmatpush.bf16.msra.mxu2 %v611_v19  ;;  %v826_v4 = vld [vmem:[#allocation10] sm:$0xff] }
  0x34   :  { %373 = vmatpush.bf16.msra.mxu3 %v675_v23  ;;  %v188_v5 = vld [vmem:[%s1087_s4] sm:$0x3] }
  0x35   :  { %386 = vmatpush.bf16.msrb.mxu0 %v615_v24  ;;  %v191_v6 = vperm.slane %v188_v5, 1  ;;  %v190_v11 = vperm.slane %v188_v5, 0  ;;  %v852_v25 = vld [vmem:[%s1089_s6] ss:$0 sm:$0xff] }
  0x36   :  { %399 = vmatpush.bf16.msrb.mxu1 %v679_v27 }
  0x37   :  { %361 = vmatpush.bf16.msra.mxu2 %v603_v31 }
  0x38   :  { %374 = vmatpush.bf16.msra.mxu3 %v667_v35 }
  0x39   :  { %387 = vmatpush.bf16.msrb.mxu0 %v607_v36 }
  0x3a   :  { %400 = vmatpush.bf16.msrb.mxu1 %v671_v39 }
  0x3b   :  { %542 = vmatpush.bf16.msrb.mxu2 %v833_v41 }
  0x3c   :  { %555 = vmatpush.bf16.msrb.mxu3 %v841_v40 }
  0x3f   :  { %543 = vmatpush.bf16.msrb.mxu2 %v832_v43 }
  0x40   :  { %556 = vmatpush.bf16.msrb.mxu3 %v840_v42 }
  0x43   :  { %544 = vmatpush.bf16.msrb.mxu2 %v831_v45 }
  0x44   :  { %557 = vmatpush.bf16.msrb.mxu3 %v839_v44 }
  0x47   :  { %545 = vmatpush.bf16.msrb.mxu2 %v830_v47 }
  0x48   :  { %558 = vmatpush.bf16.msrb.mxu3 %v838_v46 }
  0x4b   :  { %546 = vmatpush.bf16.msrb.mxu2 %v829_v63 }
  0x4c   :  { %559 = vmatpush.bf16.msrb.mxu3 %v837_v48 }
  0x4f   :  { %547 = vmatpush.bf16.msrb.mxu2 %v828_v1 }
  0x50   :  { %560 = vmatpush.bf16.msrb.mxu3 %v836_v50 }
  0x53   :  { %548 = vmatpush.bf16.msrb.mxu2 %v827_v3 }
  0x54   :  { %561 = vmatpush.bf16.msrb.mxu3 %v835_v0 }
  0x57   :  { %549 = vmatpush.bf16.msrb.mxu2 %v826_v4 }
  0x58   :  { %562 = vmatpush.bf16.msrb.mxu3 %v834_v2 }
  0x99   :  { %v135_v53 = vpop.f32.mrf.mxu0 }
  0x9a   :  { %v136_v54 = vadd.f32 %v135_v53, %v108_v51  ;;  %v148_v55 = vpop.f32.mrf.mxu1 }
  0x9b   :  { %v149_v56 = vadd.f32 %v148_v55, %v109_v52 }
  0x9c   :  { %v152_v57 = vmax.f32 %v136_v54, 0.0 }
  0x9d   :  { %v153_v58 = vmax.f32 %v149_v56, 0.0 }
  0x9e   :  { %v154_v59 = vpack.c.bf16 %v152_v57, %v152_v57 }
  0x9f   :  { %v155_v60 = vpack.c.bf16 %v153_v58, %v153_v58 }
  0xa0   :  { %362 = vmatmul.bf16.vlgmr.msra.gmra.mxu2 %v154_v59  ;;  %388 = vmatmul.bf16.vlgmr.msrb.gmra.mxu0 %v154_v59 }
  0xa1   :  { %375 = vmatmul.bf16.vlgmr.msra.gmra.mxu3 %v155_v60  ;;  %401 = vmatmul.bf16.vlgmr.msrb.gmra.mxu1 %v155_v60  ;;  %v137_v61 = vpop.f32.mrf.mxu0 }
  0xa2   :  { %v150_v62 = vpop.f32.mrf.mxu1 }
 0x11d   :  { %v389_v7 = vpop.f32.mrf.mxu0 }
 0x11e   :  { %v390_v8 = vadd.f32 %v389_v7, %v191_v6  ;;  %v402_v9 = vpop.f32.mrf.mxu1 }
 0x120   :  { %v403_v10 = vadd.f32 %v402_v9, %v390_v8 }
 0x122   :  { %v407_v12 = vmax.f32 %v403_v10, 0.0 }
 0x123   :  { %v363_v13 = vpop.f32.mrf.mxu2 }
 0x124   :  { %v409_v14 = vpack.c.bf16 %v407_v12, %v407_v12  ;;  %v364_v15 = vadd.f32 %v363_v13, %v190_v11  ;;  %v376_v16 = vpop.f32.mrf.mxu3 }
 0x125   :  { %v391_v17 = vpop.f32.mrf.mxu0 }
 0x126   :  { %v377_v18 = vadd.f32 %v376_v16, %v364_v15  ;;  %v404_v19 = vpop.f32.mrf.mxu1  ;;  %563 = vmatmul.bf16.vlgmr.msrb.gmra.mxu3 %v409_v14 }
 0x128   :  { %v406_v20 = vmax.f32 %v377_v18, 0.0 }
 0x12a   :  { %v408_v21 = vpack.c.bf16 %v406_v20, %v406_v20 }
 0x12b   :  { %v365_v22 = vpop.f32.mrf.mxu2 }
 0x12c   :  { %v378_v23 = vpop.f32.mrf.mxu3  ;;  %550 = vmatmul.bf16.vlgmr.msrb.gmra.mxu2 %v408_v21 }
 0x1a9   :  { %v564_v24 = vpop.f32.mrf.mxu3 }
 0x1af   :  { %v551_v26 = vpop.f32.mrf.mxu2 }
 0x1b0   :  { %v552_v27 = vadd.f32 %v852_v25, %v551_v26 }
 0x1b1   :  { %v566_v28 = vpop.f32.mrf.mxu3 }
 0x1b2   :  { %v565_v29 = vadd.f32 %v564_v24, %v552_v27 }
 0x1b4   :  { %853 = vtanh.f32 %v565_v29 }
 0x1b7   :  { %v553_v30 = vpop.f32.mrf.mxu2 }
 0x1ba   :  { %v854_v31 = vpop.eup %853 }
 0x1bb   :  { %v569_v32 = vpack.c.bf16 %v854_v31, %v854_v31 }
 0x1bd   :  { %570 = vst [vmem:[#allocation11] sm:$0xf] %v569_v32 }
 0x1be   :  { %581 = dma.vmem_to_hbm [thread:$0]  %s577_s29, 64, %s579_s9, [#allocation4]  }
 0x1bf   :  { %1005 = dma.done.wait [#allocation4], 64  }
 0x1c0   :  { %1006 = vsyncadd [#allocation4], 4294967232 }
 0x1c1   :  { %586 = vsyncpa [#allocation3], 1 }
 0x1c2   :  { %587 = vsyncpa [#allocation6], 1 }
 0x1c3   :  { %588 = vsyncpa [#allocation9], 1 }
 0x1c4   :  { %589 = vsyncpa [#allocation4], 1 }

</bundles_post_ra>
